<compile_context>
chip_gen: v7x
topology: tpu7x:2x2x1
jax: 0.10.0
libtpu: 0.0.40
codegen_flags: <defaults>
</compile_context>

<pallas_src>
import functools

import jax
import jax.numpy as jnp
from jax.experimental import pallas as pl
from jax.experimental.pallas import tpu as pltpu

LANE = 128      # vreg lane width  (last-dim alignment target)
SUBLANE = 8     # vreg sublane height (second-to-last-dim alignment)
MAX_TB = 1024   # batch-tile cap (per perf review; << VMEM even double-buffered)


def _round_up(n, m):
    return ((n + m - 1) // m) * m


def qnet_kernel(x_ref, w1_ref, b1_ref, w2_ref, b2_ref, w3_ref, b3_ref, o_ref):
    # One batch tile of the 3-layer MLP.
    #   x_ref : (TB, S)  f32   (unpadded state features)
    #   w1    : (S, H)   f32,  b1: (1, H) f32
    #   w2    : (H, H)   bf16, b2: (1, H) f32
    #   w3    : (H, A)   bf16, b3: (1, A) f32   (A = 128-padded action dim)
    #   o_ref : (TB, action_dim) f32
    x = x_ref[...]                                                        # (TB, S)
    h1 = jnp.dot(x, w1_ref[...], preferred_element_type=jnp.float32) + b1_ref[...]
    h1 = jnp.maximum(h1, 0.0).astype(jnp.bfloat16)                        # (TB, H)
    h2 = jnp.dot(h1, w2_ref[...], preferred_element_type=jnp.float32) + b2_ref[...]
    h2 = jnp.maximum(h2, 0.0).astype(jnp.bfloat16)                        # (TB, H)
    q = jnp.dot(h2, w3_ref[...], preferred_element_type=jnp.float32) + b3_ref[...]
    # Narrow store: only the real action columns are written back to HBM.
    o_ref[...] = q[:, : o_ref.shape[-1]]


def prepare_params(params):
    """Pad hidden/action dims to 128 lanes, cast the big weights to bf16 — done
    ONCE outside the per-step forward.  w1 stays f32 with its true state_dim
    rows (the tiny layer-1 contraction runs in f32 on the MXU)."""
    def pad2d(a, rows, cols, dtype):
        out = jnp.zeros((rows, cols), dtype)
        return out.at[: a.shape[0], : a.shape[1]].set(a.astype(dtype))

    state_dim, hidden_dim = params["w1"].shape
    action_dim = params["w3"].shape[1]
    H = _round_up(hidden_dim, LANE)
    A = _round_up(action_dim, LANE)
    return {
        "w1": pad2d(params["w1"], state_dim, H, jnp.float32),
        "b1": pad2d(params["b1"], 1, H, jnp.float32),
        "w2": pad2d(params["w2"], H, H, jnp.bfloat16),
        "b2": pad2d(params["b2"], 1, H, jnp.float32),
        "w3": pad2d(params["w3"], H, A, jnp.bfloat16),
        "b3": pad2d(params["b3"], 1, A, jnp.float32),
    }


@functools.partial(jax.jit, static_argnames=("action_dim",))
def qnetwork_forward(x, pp, *, action_dim):
    """x: (B, state_dim) f32. pp: output of prepare_params. Returns (B, action_dim) f32."""
    B, state_dim = x.shape
    H = pp["w2"].shape[0]
    A = pp["w3"].shape[1]
    assert pp["w1"].shape[0] == state_dim

    # Adaptive batch tile: large enough to amortize the ~0.35 us per-grid-step
    # overhead (cap 1024), >= 2 grid steps whenever B > 8 (v7x dual-TC sharding),
    # ragged final block via pl.cdiv instead of padding B up to a tile multiple.
    if B <= SUBLANE:
        TB = B                                    # block == full batch (allowed)
    else:
        B8 = _round_up(B, SUBLANE)
        TB = min(MAX_TB, _round_up(-(-B8 // 2), SUBLANE))
    grid = (pl.cdiv(B, TB),)

    flops = 2 * B * (state_dim * H + H * H + H * A)
    bytes_accessed = (
        x.size * 4
        + pp["w1"].size * 4 + pp["w2"].size * 2 + pp["w3"].size * 2
        + (pp["b1"].size + pp["b2"].size + pp["b3"].size) * 4
        + B * action_dim * 4)

    return pl.pallas_call(
        qnet_kernel,
        out_shape=jax.ShapeDtypeStruct((B, action_dim), jnp.float32),
        grid=grid,
        in_specs=[
            pl.BlockSpec((TB, state_dim), lambda i: (i, 0)),  # x: batch-tiled, unpadded
            pl.BlockSpec((state_dim, H), lambda i: (0, 0)),   # weights / biases:
            pl.BlockSpec((1, H), lambda i: (0, 0)),           #   constant block index
            pl.BlockSpec((H, H), lambda i: (0, 0)),           #   -> DMA'd once, VMEM-
            pl.BlockSpec((1, H), lambda i: (0, 0)),           #   resident across the
            pl.BlockSpec((H, A), lambda i: (0, 0)),           #   whole batch grid
            pl.BlockSpec((1, A), lambda i: (0, 0)),
        ],
        out_specs=pl.BlockSpec((TB, action_dim), lambda i: (i, 0)),
        compiler_params=pltpu.CompilerParams(
            dimension_semantics=("parallel",)),               # v7x: batch over 2 TCs
        cost_estimate=pl.CostEstimate(
            flops=flops, transcendentals=0, bytes_accessed=bytes_accessed),
    )(x, pp["w1"], pp["b1"], pp["w2"], pp["b2"], pp["w3"], pp["b3"])


def init_params(key, state_dim, action_dim, hidden_dim):
    """Deterministic synthetic init (uniform, PyTorch-Linear-style fan_in bound).
    Weights are (in, out) — transposed vs. torch — so forward is x @ W + b."""
    ks = jax.random.split(key, 6)

    def linear(kw, kb, fan_in, fan_out):
        bound = 1.0 / jnp.sqrt(fan_in)
        w = jax.random.uniform(kw, (fan_in, fan_out), jnp.float32, -bound, bound)
        b = jax.random.uniform(kb, (1, fan_out), jnp.float32, -bound, bound)
        return w, b

    w1, b1 = linear(ks[0], ks[1], state_dim, hidden_dim)
    w2, b2 = linear(ks[2], ks[3], hidden_dim, hidden_dim)
    w3, b3 = linear(ks[4], ks[5], hidden_dim, action_dim)
    return {"w1": w1, "b1": b1, "w2": w2, "b2": b2, "w3": w3, "b3": b3}


if __name__ == "__main__":
    key = jax.random.PRNGKey(0)
    k_x, k_p, k_x2 = jax.random.split(key, 3)

    batch, state_dim, action_dim, hidden_dim = 8, 4, 2, 32
    params = init_params(k_p, state_dim, action_dim, hidden_dim)
    pp = prepare_params(params)

    # Pure-JAX reference using the identical precision scheme
    # (layer 1 f32; layers 2/3 bf16 operands, f32 accumulate).
    def ref_forward(xv):
        bf = lambda a: a.astype(jnp.bfloat16)
        h = jnp.dot(xv, params["w1"], preferred_element_type=jnp.float32) + params["b1"]
        h = jnp.maximum(h, 0.0).astype(jnp.bfloat16)
        h = jnp.dot(h, bf(params["w2"]), preferred_element_type=jnp.float32) + params["b2"]
        h = jnp.maximum(h, 0.0).astype(jnp.bfloat16)
        return jnp.dot(h, bf(params["w3"]), preferred_element_type=jnp.float32) + params["b3"]

    x = jax.random.normal(k_x, (batch, state_dim), jnp.float32)
    out = qnetwork_forward(x, pp, action_dim=action_dim)
    jax.block_until_ready(out)
    assert out.shape == (batch, action_dim)
    assert jnp.allclose(out, ref_forward(x), atol=1e-2, rtol=1e-2)

    # Ragged-grid check: B not a multiple of the batch tile -> >= 2 grid steps
    # with a masked final block (perf-review correctness concern).
    x2 = jax.random.normal(k_x2, (13, state_dim), jnp.float32)
    out2 = qnetwork_forward(x2, pp, action_dim=action_dim)
    jax.block_until_ready(out2)
    assert out2.shape == (13, action_dim)
    assert jnp.allclose(out2, ref_forward(x2), atol=1e-2, rtol=1e-2)

    print("KERNEL_OK")
</pallas_src>

<mosaic_0001>
module attributes {stable_mosaic.version = 11 : i64} {
  func.func @qnet_kernel(%arg0: i32, %arg1: memref<8x4xf32, #tpu.memory_space<vmem>>, %arg2: memref<4x128xf32, #tpu.memory_space<vmem>>, %arg3: memref<1x128xf32, #tpu.memory_space<vmem>>, %arg4: memref<128x128xbf16, #tpu.memory_space<vmem>>, %arg5: memref<1x128xf32, #tpu.memory_space<vmem>>, %arg6: memref<128x128xbf16, #tpu.memory_space<vmem>>, %arg7: memref<1x128xf32, #tpu.memory_space<vmem>>, %arg8: memref<8x2xf32, #tpu.memory_space<vmem>>) attributes {dimension_semantics = [#tpu.dimension_semantics<parallel>], iteration_bounds = array<i64: 1>, scalar_prefetch = 0 : i64, scratch_operands = 0 : i64, tpu.core_type = #tpu.core_type<tc>, window_params = [{transform_indices = @transform_0, window_bounds = array<i64: 8, 4>}, {pipeline_mode = #tpu.pipeline_mode<synchronous>, transform_indices = @transform_1, window_bounds = array<i64: 4, 128>}, {pipeline_mode = #tpu.pipeline_mode<synchronous>, transform_indices = @transform_2, window_bounds = array<i64: 1, 128>}, {pipeline_mode = #tpu.pipeline_mode<synchronous>, transform_indices = @transform_3, window_bounds = array<i64: 128, 128>}, {pipeline_mode = #tpu.pipeline_mode<synchronous>, transform_indices = @transform_4, window_bounds = array<i64: 1, 128>}, {pipeline_mode = #tpu.pipeline_mode<synchronous>, transform_indices = @transform_5, window_bounds = array<i64: 128, 128>}, {pipeline_mode = #tpu.pipeline_mode<synchronous>, transform_indices = @transform_6, window_bounds = array<i64: 1, 128>}, {transform_indices = @transform_7, window_bounds = array<i64: 8, 2>}]} {
    %c0 = arith.constant 0 : index
    %c0_0 = arith.constant 0 : index
    %0 = vector.load %arg1[%c0, %c0_0] : memref<8x4xf32, #tpu.memory_space<vmem>>, vector<8x4xf32>
    %c0_1 = arith.constant 0 : index
    %c0_2 = arith.constant 0 : index
    %1 = vector.load %arg2[%c0_1, %c0_2] : memref<4x128xf32, #tpu.memory_space<vmem>>, vector<4x128xf32>
    %cst = arith.constant dense<0.000000e+00> : vector<8x128xf32>
    %2 = tpu.matmul %0, %1, %cst {dimension_numbers = #tpu.dot_dimension_numbers<[1], [0], [0], [1], [0, 0, 1, 1], [], []>} : vector<8x4xf32>, vector<4x128xf32>, vector<8x128xf32> -> vector<8x128xf32>
    %c0_3 = arith.constant 0 : index
    %c0_4 = arith.constant 0 : index
    %3 = vector.load %arg3[%c0_3, %c0_4] : memref<1x128xf32, #tpu.memory_space<vmem>>, vector<1x128xf32>
    %4 = vector.broadcast %3 : vector<1x128xf32> to vector<8x128xf32>
    %5 = arith.addf %2, %4 : vector<8x128xf32>
    %cst_5 = arith.constant 0.000000e+00 : f32
    %6 = vector.broadcast %cst_5 : f32 to vector<8x128xf32>
    %7 = arith.maximumf %5, %6 : vector<8x128xf32>
    %8 = arith.truncf %7 : vector<8x128xf32> to vector<8x128xbf16>
    %c0_6 = arith.constant 0 : index
    %c0_7 = arith.constant 0 : index
    %9 = vector.load %arg4[%c0_6, %c0_7] : memref<128x128xbf16, #tpu.memory_space<vmem>>, vector<128x128xbf16>
    %cst_8 = arith.constant dense<0.000000e+00> : vector<8x128xf32>
    %10 = tpu.matmul %8, %9, %cst_8 {dimension_numbers = #tpu.dot_dimension_numbers<[1], [0], [0], [1], [0, 0, 1, 1], [], []>} : vector<8x128xbf16>, vector<128x128xbf16>, vector<8x128xf32> -> vector<8x128xf32>
    %c0_9 = arith.constant 0 : index
    %c0_10 = arith.constant 0 : index
    %11 = vector.load %arg5[%c0_9, %c0_10] : memref<1x128xf32, #tpu.memory_space<vmem>>, vector<1x128xf32>
    %12 = vector.broadcast %11 : vector<1x128xf32> to vector<8x128xf32>
    %13 = arith.addf %10, %12 : vector<8x128xf32>
    %cst_11 = arith.constant 0.000000e+00 : f32
    %14 = vector.broadcast %cst_11 : f32 to vector<8x128xf32>
    %15 = arith.maximumf %13, %14 : vector<8x128xf32>
    %16 = arith.truncf %15 : vector<8x128xf32> to vector<8x128xbf16>
    %c0_12 = arith.constant 0 : index
    %c0_13 = arith.constant 0 : index
    %17 = vector.load %arg6[%c0_12, %c0_13] : memref<128x128xbf16, #tpu.memory_space<vmem>>, vector<128x128xbf16>
    %cst_14 = arith.constant dense<0.000000e+00> : vector<8x128xf32>
    %18 = tpu.matmul %16, %17, %cst_14 {dimension_numbers = #tpu.dot_dimension_numbers<[1], [0], [0], [1], [0, 0, 1, 1], [], []>} : vector<8x128xbf16>, vector<128x128xbf16>, vector<8x128xf32> -> vector<8x128xf32>
    %c0_15 = arith.constant 0 : index
    %c0_16 = arith.constant 0 : index
    %19 = vector.load %arg7[%c0_15, %c0_16] : memref<1x128xf32, #tpu.memory_space<vmem>>, vector<1x128xf32>
    %20 = vector.broadcast %19 : vector<1x128xf32> to vector<8x128xf32>
    %21 = arith.addf %18, %20 : vector<8x128xf32>
    %22 = vector.extract_strided_slice %21 {offsets = [0, 0], sizes = [8, 2], strides = [1, 1]} : vector<8x128xf32> to vector<8x2xf32>
    %c0_17 = arith.constant 0 : index
    %c0_18 = arith.constant 0 : index
    %23 = vector.load %arg8[%c0_17, %c0_18] : memref<8x2xf32, #tpu.memory_space<vmem>>, vector<8x2xf32>
    tpu.vector_store %arg8[%c0_17, %c0_18], %22 {strides = array<i32>} : memref<8x2xf32, #tpu.memory_space<vmem>>, vector<8x2xf32>,
    return
  }
  func.func @transform_0(%arg0: i32) -> (i32, i32) {
    %c0_i32 = arith.constant 0 : i32
    %c0_i32_0 = arith.constant 0 : i32
    return %arg0, %c0_i32 : i32, i32
  }
  func.func @transform_1(%arg0: i32) -> (i32, i32) {
    %c0_i32 = arith.constant 0 : i32
    %c0_i32_0 = arith.constant 0 : i32
    %c0_i32_1 = arith.constant 0 : i32
    return %c0_i32, %c0_i32_0 : i32, i32
  }
  func.func @transform_2(%arg0: i32) -> (i32, i32) {
    %c0_i32 = arith.constant 0 : i32
    %c0_i32_0 = arith.constant 0 : i32
    %c0_i32_1 = arith.constant 0 : i32
    return %c0_i32, %c0_i32_0 : i32, i32
  }
  func.func @transform_3(%arg0: i32) -> (i32, i32) {
    %c0_i32 = arith.constant 0 : i32
    %c0_i32_0 = arith.constant 0 : i32
    %c0_i32_1 = arith.constant 0 : i32
    return %c0_i32, %c0_i32_0 : i32, i32
  }
  func.func @transform_4(%arg0: i32) -> (i32, i32) {
    %c0_i32 = arith.constant 0 : i32
    %c0_i32_0 = arith.constant 0 : i32
    %c0_i32_1 = arith.constant 0 : i32
    return %c0_i32, %c0_i32_0 : i32, i32
  }
  func.func @transform_5(%arg0: i32) -> (i32, i32) {
    %c0_i32 = arith.constant 0 : i32
    %c0_i32_0 = arith.constant 0 : i32
    %c0_i32_1 = arith.constant 0 : i32
    return %c0_i32, %c0_i32_0 : i32, i32
  }
  func.func @transform_6(%arg0: i32) -> (i32, i32) {
    %c0_i32 = arith.constant 0 : i32
    %c0_i32_0 = arith.constant 0 : i32
    %c0_i32_1 = arith.constant 0 : i32
    return %c0_i32, %c0_i32_0 : i32, i32
  }
  func.func @transform_7(%arg0: i32) -> (i32, i32) {
    %c0_i32 = arith.constant 0 : i32
    %c0_i32_0 = arith.constant 0 : i32
    return %arg0, %c0_i32 : i32, i32
  }
}

</mosaic_0001>

<bundles_post_ra>
// kernel: qnetwork_forward.1
= control target key start
LH: loop header
LB: loop body
LE: loop exit
PB: predicated region body
PF: predicated region fallthrough
CT: control target
= control target key end

     0   :  { %12 = vsyncpa [#allocation3], 0  ;;  %s640_s0 = inlined_call_operand.vmem [shape: f32[8,4], index: 0, kind: input, shape index: {}]   ;;  %s641_s1 = inlined_call_operand.vmem [shape: f32[4,128], index: 1, kind: input, shape index: {}]   ;;  %s642_s2 = inlined_call_operand.vmem [shape: f32[1,128], index: 2, kind: input, shape index: {}]   ;;  %s643_s3 = inlined_call_operand.hbm [shape: bf16[128,128], index: 3, kind: input, shape index: {}]   ;;  %s644_s4 = inlined_call_operand.vmem [shape: f32[1,128], index: 4, kind: input, shape index: {}]   ;;  %s645_s5 = inlined_call_operand.hbm [shape: bf16[128,128], index: 5, kind: input, shape index: {}]   ;;  %s646_s6 = inlined_call_operand.vmem [shape: f32[1,128], index: 6, kind: input, shape index: {}]   ;;  %s647_s7 = inlined_call_operand.vmem [shape: f32[8,2], index: 7, kind: output, shape index: {}]  }
   0x1   :  { %13 = vsyncpa [#allocation5], 0  ;;  %s532_s24 = smov [#allocation2]   ;;  %s484_s28 = scalar_lea.hbm %s643_s3, 1024 }
   0x2   :  { %s25_s25 = sshll.u32 %s532_s24, 4  ;;  %p485_p0 = scmp.ne.s32.totalorder %s643_s3, %s484_s28  ;;  %s26_s25 = int_to_ptr.vmem [resolvable:$true] %s25_s25 }
   0x3   :  { %p488_p1 = scmp.lt.u32.totalorder %s484_s28, %s643_s3 }
   0x5   :  { %p490_p2 = pnand %p488_p1, %p485_p0 }
   0x7   :  { %493 = shalt.err (!%p490_p2)
}
   0x8   :  { %s494_s10 = scalar_lea.vmem %s26_s25, 1024  ;;  %p499_p4 = scmp.lt.s32.totalorder %s26_s25, %s26_s25 }
   0x9   :  { %p495_p3 = scmp.ne.s32.totalorder %s26_s25, %s494_s10  ;;  %p500_p5 = scmp.lt.s32.totalorder %s494_s10, %s494_s10 }
   0xb   :  { %p501_p6 = por %p500_p5, %p499_p4 }
   0xd   :  { %p502_p7 = pnand %p501_p6, %p495_p3 }
   0xf   :  { %505 = shalt.err (!%p502_p7)
}
  0x10   :  { %s533_s11 = smov 64   ;;  %s534_s12 = smov 4  }
  0x11   :  { %31 = dma.hbm_to_vmem [thread:$0]  %s643_s3, 1024, %s26_s25, [#allocation3], %s533_s11, %s533_s11, %s534_s12  }
  0x12   :  { %s535_s15 = smov [#allocation4]   ;;  %s506_s19 = scalar_lea.hbm %s645_s5, 1024 }
  0x13   :  { %s39_s16 = sshll.u32 %s535_s15, 4  ;;  %p507_p8 = scmp.ne.s32.totalorder %s645_s5, %s506_s19  ;;  %s40_s16 = int_to_ptr.vmem [resolvable:$true] %s39_s16 }
  0x14   :  { %p510_p9 = scmp.lt.u32.totalorder %s506_s19, %s645_s5 }
  0x16   :  { %p512_p10 = pnand %p510_p9, %p507_p8 }
  0x18   :  { %515 = shalt.err (!%p512_p10)
}
  0x19   :  { %s516_s24 = scalar_lea.vmem %s40_s16, 1024  ;;  %p521_p12 = scmp.lt.s32.totalorder %s40_s16, %s40_s16 }
  0x1a   :  { %p517_p11 = scmp.ne.s32.totalorder %s40_s16, %s516_s24  ;;  %p522_p13 = scmp.lt.s32.totalorder %s516_s24, %s516_s24 }
  0x1c   :  { %p523_p0 = por %p522_p13, %p521_p12 }
  0x1e   :  { %p524_p1 = pnand %p523_p0, %p517_p11 }
  0x20   :  { %527 = shalt.err (!%p524_p1)
}
  0x21   :  { %45 = dma.hbm_to_vmem [thread:$0]  %s645_s5, 1024, %s40_s16, [#allocation5], %s533_s11, %s533_s11, %s534_s12  }
  0x22   :  { %528 = dma.done.wait [#allocation3], 1024  }
  0x23   :  { %529 = vsyncadd [#allocation3], 4294966272 }
  0x24   :  { %530 = dma.done.wait [#allocation5], 1024  }
  0x25   :  { %531 = vsyncadd [#allocation5], 4294966272  ;;  %v536_v0 = vmov 0.0   ;;  %vm537_vm0 = vmmov 0   ;;  %vm68_vm1 = vcmask 1043456   ;;  %vm64_vm2 = vcmask 31744  }
  0x26   :  { %417 = vmatprep.subr.mxu0 %v536_v0  ;;  %419 = vmatprep.mubr.msk.f32.mxu0 %vm537_vm0, %v536_v0  ;;  %v56_v1 = vld [vmem:[%s641_s1] sm:$0xf]  ;;  %v469_v4 = vld [vmem:[#allocation2 + $0x8] sm:$0xff]   ;;  %v470_v5 = vld [vmem:[#allocation2 + $0x10] sm:$0xff]   ;;  %vm368_vm3 = vcmask 15360  }
  0x27   :  { %422 = vmatprep.subr.bf16.mxu1 %v536_v0  ;;  %438 = vmatprep.mubr.msk.bf16.mxu1 %vm537_vm0, %v536_v0  ;;  %v55_v2 = vld [vmem:[%s640_s0] sm:$0xff]  ;;  %v471_v6 = vld [vmem:[#allocation2 + $0x18] sm:$0xff]   ;;  %v473_v8 = vld [vmem:[#allocation2 + $0x28] sm:$0xff]  }
  0x28   :  { %418 = vmatpush3.msk.msra.mxu0 %vm68_vm1, %v56_v1  ;;  %v468_v3 = vld [vmem:[#allocation2] sm:$0xff]   ;;  %v474_v9 = vld [vmem:[#allocation2 + $0x30] sm:$0xff]   ;;  %v475_v10 = vld [vmem:[#allocation2 + $0x38] sm:$0xff]  }
  0x29   :  { %420 = vmatmul.mubr.msk.f32.vlgmr.msra.gmra.mrb[0].mxu0 %vm64_vm2, %v55_v2  ;;  %442 = vmatprep.subr.bf16.mxu0 %v536_v0  ;;  %v472_v7 = vld [vmem:[#allocation2 + $0x20] sm:$0xff]   ;;  %v477_v12 = vld [vmem:[#allocation4 + $0x8] sm:$0xff]   ;;  %v478_v13 = vld [vmem:[#allocation4 + $0x10] sm:$0xff]  }
  0x2a   :  { %423 = vmatpush3.bf16.msra.mxu1 %v468_v3  ;;  %458 = vmatprep.mubr.msk.bf16.mxu0 %vm537_vm0, %v536_v0  ;;  %v476_v11 = vld [vmem:[#allocation4] sm:$0xff]   ;;  %v479_v14 = vld [vmem:[#allocation4 + $0x18] sm:$0xff]   ;;  %v481_v16 = vld [vmem:[#allocation4 + $0x28] sm:$0xff]  }
  0x2b   :  { %424 = vmatprep.subr.bf16.mxu1 %v536_v0  ;;  %443 = vmatpush3.bf16.msra.mxu0 %v476_v11  ;;  %v480_v15 = vld [vmem:[#allocation4 + $0x20] sm:$0xff]   ;;  %v482_v23 = vld [vmem:[#allocation4 + $0x30] sm:$0xff]   ;;  %v483_v24 = vld [vmem:[#allocation4 + $0x38] sm:$0xff]  }
  0x2c   :  { %444 = vmatprep.subr.bf16.mxu0 %v536_v0  ;;  %v376_v17 = vld [vmem:[%s642_s2] ss:$0 sm:$0xff] }
  0x2d   :  { %v379_v25 = vld [vmem:[%s644_s4] ss:$0 sm:$0xff] }
  0x2e   :  { %425 = vmatpush3.bf16.msra.mxu1 %v469_v4  ;;  %v388_v33 = vld [vmem:[%s646_s6] ss:$0 sm:$0xff] }
  0x2f   :  { %426 = vmatprep.subr.bf16.mxu1 %v536_v0  ;;  %445 = vmatpush3.bf16.msra.mxu0 %v477_v12 }
  0x30   :  { %446 = vmatprep.subr.bf16.mxu0 %v536_v0 }
  0x32   :  { %427 = vmatpush3.bf16.msra.mxu1 %v470_v5 }
  0x33   :  { %428 = vmatprep.subr.bf16.mxu1 %v536_v0  ;;  %447 = vmatpush3.bf16.msra.mxu0 %v478_v13 }
  0x34   :  { %448 = vmatprep.subr.bf16.mxu0 %v536_v0 }
  0x36   :  { %429 = vmatpush3.bf16.msra.mxu1 %v471_v6 }
  0x37   :  { %430 = vmatprep.subr.bf16.mxu1 %v536_v0  ;;  %449 = vmatpush3.bf16.msra.mxu0 %v479_v14 }
  0x38   :  { %450 = vmatprep.subr.bf16.mxu0 %v536_v0 }
  0x3a   :  { %431 = vmatpush3.bf16.msra.mxu1 %v472_v7 }
  0x3b   :  { %432 = vmatprep.subr.bf16.mxu1 %v536_v0  ;;  %451 = vmatpush3.bf16.msra.mxu0 %v480_v15 }
  0x3c   :  { %452 = vmatprep.subr.bf16.mxu0 %v536_v0 }
  0x3e   :  { %433 = vmatpush3.bf16.msra.mxu1 %v473_v8 }
  0x3f   :  { %434 = vmatprep.subr.bf16.mxu1 %v536_v0  ;;  %453 = vmatpush3.bf16.msra.mxu0 %v481_v16 }
  0x40   :  { %454 = vmatprep.subr.bf16.mxu0 %v536_v0 }
  0x42   :  { %435 = vmatpush3.bf16.msra.mxu1 %v474_v9 }
  0x43   :  { %436 = vmatprep.subr.bf16.mxu1 %v536_v0  ;;  %455 = vmatpush3.bf16.msra.mxu0 %v482_v23 }
  0x44   :  { %456 = vmatprep.subr.bf16.mxu0 %v536_v0 }
  0x46   :  { %437 = vmatpush3.bf16.msra.mxu1 %v475_v10 }
  0x47   :  { %457 = vmatpush3.bf16.msra.mxu0 %v483_v24 }
  0xfc   :  { %v138_v18 = vpop.f32.mrb[0].mxu0 }
  0xfd   :  { %v139_v19 = vadd.f32 %v376_v17, %v138_v18  ;;  %v421_v20 = vpop.f32.mrb[1].mxu0 }
  0xff   :  { %v142_v21 = vmax.f32 %v139_v19, 0.0 }
 0x101   :  { %v143_v22 = vpack.c.bf16 %v142_v21, %v142_v21 }
 0x103   :  { %439 = vmatmul.mubr.bf16.vlgmr.msra.gmra.mrb[0].mxu1 %v143_v22 }
 0x1d6   :  { %v249_v26 = vpop.f32.mrb[0].mxu1 }
 0x1d7   :  { %v250_v27 = vadd.f32 %v379_v25, %v249_v26  ;;  %v440_v28 = vpop.f32.mrb[1].mxu1 }
 0x1d8   :  { %v252_v29 = vpop.f32.mrb[2].mxu1 }
 0x1d9   :  { %v255_v30 = vmax.f32 %v250_v27, 0.0  ;;  %v441_v31 = vpop.f32.mrb[3].mxu1 }
 0x1db   :  { %v256_v32 = vpack.c.bf16 %v255_v30, %v255_v30 }
 0x1dd   :  { %459 = vmatmul.mubr.bf16.vlgmr.msra.gmra.mrb[4].mxu0 %v256_v32 }
 0x2b0   :  { %v362_v34 = vpop.f32.mrb[4].mxu0 }
 0x2b1   :  { %v363_v35 = vadd.f32 %v388_v33, %v362_v34  ;;  %v460_v36 = vpop.f32.mrb[5].mxu0 }
 0x2b2   :  { %v365_v37 = vpop.f32.mrb[6].mxu0 }
 0x2b3   :  { %369 = vst.msk [vmem:[%s647_s7] sm:$0xff] %vm368_vm3, %v363_v35  ;;  %v461_v38 = vpop.f32.mrb[7].mxu0 }
 0x2b4   :  { %374 = vsyncpa [#allocation3], 1 }
 0x2b5   :  { %375 = vsyncpa [#allocation5], 1 }

</bundles_post_ra>
